<compile_context>
chip_gen: v5e
topology: v5e:2x2
jax: 0.10.0
libtpu: 0.0.40
codegen_flags: <defaults>
</compile_context>

<pallas_src>
import functools

import jax
import jax.numpy as jnp
from jax.experimental import pallas as pl
from jax.experimental.pallas import tpu as pltpu


def _unfold_kernel(x_ref, o_ref, pad_ref, *, h, w, k, halo_alloc, halo_need):
    """Processes one block of Cblk flattened planes.

    x_ref:   (Cblk, L)                  input planes (L = h*w), native dtype
    o_ref:   (Cblk, k*k*L)              k*k shifted copies per plane, lane-dense
    pad_ref: (Cblk, L + 2*halo_alloc)   VMEM scratch: [.. zero | plane | zero ..]
    """
    pad = k // 2
    L = h * w
    n = x_ref.shape[0]
    dtype = x_ref.dtype

    # Stage the planes into the haloed flat scratch.  Only the halo_need = pad*(w+1)
    # elements per side that shifted reads can actually touch are zeroed.  This is
    # done every grid step (NOT hoisted behind program_id==0) so the kernel stays
    # correct when the parallel grid axis is sharded across v7x's two TensorCores.
    if halo_need > 0:
        z = jnp.zeros((n, halo_need), dtype)
        pad_ref[:, pl.ds(halo_alloc - halo_need, halo_need)] = z
        pad_ref[:, pl.ds(halo_alloc + L, halo_need)] = z
    # halo_alloc is a multiple of 128 -> the plane copy is a lane-aligned dense store.
    pad_ref[:, pl.ds(halo_alloc, L)] = x_ref[...]

    # Column index of every flattened output position (shared across the block).
    col = jax.lax.broadcasted_iota(jnp.int32, (1, L), 1) % w

    col_masks = {}
    for q in range(k * k):                       # static unroll: k*k shifted copies
        dy = q // k - pad
        dx = q % k - pad
        shift = dy * w + dx
        # shifted[p] = x_flat[p + shift]; vertical OOB lands in the zero halos,
        # horizontal OOB is zeroed by the column mask.
        s = pad_ref[:, pl.ds(halo_alloc + shift, L)]
        if dx != 0:
            if dx not in col_masks:
                col_masks[dx] = (col + dx >= 0) & (col + dx < w)
            s = jnp.where(col_masks[dx], s, jnp.zeros((), dtype))
        o_ref[:, pl.ds(q * L, L)] = s


def unfold(x, kernel_size=3, *, block_planes=None):
    """Pallas implementation of Unfold.forward (identity conv weights folded away).

    x: (b, c, h, w)  ->  (b, c*k*k, h*w)
    """
    b, c, h, w = x.shape
    k = kernel_size
    assert k % 2 == 1, "padding=k//2 only preserves (h, w) for odd kernel_size"
    kk = k * k
    L = h * w
    N = b * c
    pad = k // 2

    # Minimal halo each side = largest |flat shift|; allocate it rounded to 128 lanes
    # so the plane copy into scratch stays aligned (only halo_need of it is zeroed).
    halo_need = pad * (w + 1)
    halo_alloc = (-(-halo_need // 128) * 128) if halo_need > 0 else 0

    itemsize = int(jnp.dtype(x.dtype).itemsize)
    # Sub-32-bit dtypes pack along sublanes: 8 (f32), 16 (bf16), 32 (int8/fp8).
    sublane = 8 * max(1, 4 // itemsize)

    # Generation-aware VMEM budget (v5e/v6e: 128 MiB, v7x: 64 MiB per TC); keep
    # ~20% headroom below the explicit scoped limit for Pallas-internal scratch.
    try:
        vmem_cap = int(getattr(pltpu.get_tpu_info(), "vmem_capacity_bytes", 0))
    except Exception:
        vmem_cap = 0
    if vmem_cap < (16 << 20):
        vmem_cap = 64 << 20                       # conservative fallback (v7x per-TC)
    vmem_limit = min(vmem_cap, max(32 << 20, int(vmem_cap * 0.8)))
    budget = int(vmem_limit * 0.6)                # what our (double-buffered) blocks may use

    # Per-plane VMEM footprint: double-buffered input + double-buffered output + scratch.
    plane_bytes = (2 * L + 2 * kk * L + (L + 2 * halo_alloc)) * itemsize

    min_cblk = min(N, sublane)
    if min_cblk * plane_bytes > budget:
        # Very large planes: grow the limit toward physical VMEM for the minimum block.
        # TODO(synk): tile L across a second grid axis (row blocks with pad-row halos)
        # instead of forcing `sublane` whole planes when h*w is huge (e.g. 224x224 f32).
        needed = min_cblk * plane_bytes
        budget = needed
        vmem_limit = min(vmem_cap, needed + (needed >> 2))

    # Size Cblk to fill the budget (amortizes the ~0.35us per-step overhead).
    cblk = min(N, budget // plane_bytes)
    if block_planes is not None:
        cblk = min(cblk, int(block_planes))
    cblk = max(cblk, min_cblk)
    if cblk < N:
        cblk = max(sublane, (cblk // sublane) * sublane)   # sublane-dense plane blocks
    cblk = int(min(cblk, N))

    # Guarantee >= 2 grid steps (when N allows) so v7x megacore sharding of the
    # "parallel" axis keeps both TensorCores busy; costs at most one extra ~0.35us
    # step on single-TC chips (v5e/v6e).
    if cblk == N and N > sublane:
        cblk = int(min(N, -(-(-(-N // 2)) // sublane) * sublane))

    x_flat = x.reshape(N, L)                      # free view (row-major)

    out = pl.pallas_call(
        functools.partial(_unfold_kernel, h=h, w=w, k=k,
                          halo_alloc=halo_alloc, halo_need=halo_need),
        out_shape=jax.ShapeDtypeStruct((N, kk * L), x.dtype),
        grid=(pl.cdiv(N, cblk),),
        in_specs=[pl.BlockSpec((cblk, L), lambda i: (i, 0))],
        out_specs=pl.BlockSpec((cblk, kk * L), lambda i: (i, 0)),
        scratch_shapes=[pltpu.VMEM((cblk, L + 2 * halo_alloc), x.dtype)],
        compiler_params=pltpu.CompilerParams(
            dimension_semantics=("parallel",),
            vmem_limit_bytes=int(vmem_limit)),
        cost_estimate=pl.CostEstimate(
            flops=0, transcendentals=0,
            bytes_accessed=(1 + kk) * N * L * itemsize),
    )(x_flat)

    # (b*c, kk*h*w) -> (b, c*kk, h*w): identical element order to torch's
    # conv2d(...).reshape(b, c*k*k, h*w); pure view, no data movement.
    return out.reshape(b, c * kk, h * w)


def unfold_ref(x, kernel_size=3):
    """Pure-JAX reference (mirrors F.conv2d with the one-hot eye kernels)."""
    b, c, h, w = x.shape
    k = kernel_size
    pad = k // 2
    xp = jnp.pad(x, ((0, 0), (0, 0), (pad, pad), (pad, pad)))
    planes = [xp[:, :, i:i + h, j:j + w] for i in range(k) for j in range(k)]
    out = jnp.stack(planes, axis=2)               # (b, c, k*k, h, w)
    return out.reshape(b, c * k * k, h * w)


if __name__ == "__main__":
    key = jax.random.PRNGKey(0)
    b, c, h, w = 2, 4, 16, 16
    kernel_size = 3

    x = jax.random.normal(key, (b, c, h, w), dtype=jnp.float32)

    # The module's fixed, non-trainable conv weights are eye(k*k); the kernel folds
    # this identity away (the op is pure data movement, exact in any dtype).
    weights = jnp.eye(kernel_size ** 2, dtype=jnp.float32).reshape(
        kernel_size ** 2, 1, kernel_size, kernel_size)
    assert jnp.array_equal(weights.reshape(9, 9), jnp.eye(9, dtype=jnp.float32))

    y = jax.block_until_ready(unfold(x, kernel_size))
    y_ref = unfold_ref(x, kernel_size)
    assert y.shape == (b, c * kernel_size ** 2, h * w), y.shape
    assert jnp.array_equal(y, y_ref), float(jnp.max(jnp.abs(y - y_ref)))

    # A typical stvit plane size (14x14 -> L not a multiple of 128), multi-step grid.
    x2 = jax.random.normal(jax.random.PRNGKey(1), (2, 24, 14, 14), dtype=jnp.float32)
    y2 = jax.block_until_ready(unfold(x2, kernel_size, block_planes=16))
    assert jnp.array_equal(y2, unfold_ref(x2, kernel_size))

    # bf16 (sublane tile 16), auto block sizing -> exercises the forced 2-step split
    # and a partial last block.
    x3 = jax.random.normal(jax.random.PRNGKey(2), (2, 24, 14, 14),
                           dtype=jnp.float32).astype(jnp.bfloat16)
    y3 = jax.block_until_ready(unfold(x3, kernel_size))
    assert jnp.array_equal(y3, unfold_ref(x3, kernel_size))

    print("KERNEL_OK")
</pallas_src>

<mosaic_0001>
module attributes {stable_mosaic.version = 11 : i64} {
  func.func @_unfold_kernel(%arg0: i32, %arg1: memref<8x256xf32, #tpu.memory_space<vmem>>, %arg2: memref<8x2304xf32, #tpu.memory_space<vmem>>, %arg3: memref<8x512xf32, #tpu.memory_space<vmem>>) attributes {dimension_semantics = [#tpu.dimension_semantics<parallel>], iteration_bounds = array<i64: 1>, scalar_prefetch = 0 : i64, scratch_operands = 1 : i64, tpu.core_type = #tpu.core_type<tc>, window_params = [{transform_indices = @transform_0, window_bounds = array<i64: 8, 256>}, {transform_indices = @transform_1, window_bounds = array<i64: 8, 2304>}]} {
    %cst = arith.constant 0.000000e+00 : f32
    %0 = vector.broadcast %cst : f32 to vector<8x17xf32>
    %c0 = arith.constant 0 : index
    %c111 = arith.constant 111 : index
    %1 = vector.load %arg3[%c0, %c111] : memref<8x512xf32, #tpu.memory_space<vmem>>, vector<8x17xf32>
    tpu.vector_store %arg3[%c0, %c111], %0 {strides = array<i32>} : memref<8x512xf32, #tpu.memory_space<vmem>>, vector<8x17xf32>,
    %c0_0 = arith.constant 0 : index
    %c384 = arith.constant 384 : index
    %2 = vector.load %arg3[%c0_0, %c384] : memref<8x512xf32, #tpu.memory_space<vmem>>, vector<8x17xf32>
    tpu.vector_store %arg3[%c0_0, %c384], %0 {strides = array<i32>} : memref<8x512xf32, #tpu.memory_space<vmem>>, vector<8x17xf32>,
    %c0_1 = arith.constant 0 : index
    %c0_2 = arith.constant 0 : index
    %3 = vector.load %arg1[%c0_1, %c0_2] : memref<8x256xf32, #tpu.memory_space<vmem>>, vector<8x256xf32>
    %c0_3 = arith.constant 0 : index
    %c128 = arith.constant 128 : index
    %4 = vector.load %arg3[%c0_3, %c128] : memref<8x512xf32, #tpu.memory_space<vmem>>, vector<8x256xf32>
    tpu.vector_store %arg3[%c0_3, %c128], %3 {strides = array<i32>} : memref<8x512xf32, #tpu.memory_space<vmem>>, vector<8x256xf32>,
    %5 = tpu.iota {dimensions = array<i32: 1>} : vector<1x256xi32>
    %c16_i32 = arith.constant 16 : i32
    %c0_i32 = arith.constant 0 : i32
    %6 = arith.cmpi eq, %c16_i32, %c0_i32 : i32
    %c1_i32 = arith.constant 1 : i32
    %7 = arith.select %6, %c1_i32, %c16_i32 : i32
    %8 = vector.broadcast %7 : i32 to vector<1x256xi32>
    %9 = arith.remsi %5, %8 : vector<1x256xi32>
    %c0_i32_4 = arith.constant 0 : i32
    %10 = vector.broadcast %c0_i32_4 : i32 to vector<1x256xi32>
    %11 = arith.cmpi ne, %9, %10 : vector<1x256xi32>
    %c0_i32_5 = arith.constant 0 : i32
    %12 = vector.broadcast %c0_i32_5 : i32 to vector<1x256xi32>
    %13 = arith.cmpi slt, %9, %12 : vector<1x256xi32>
    %c0_i32_6 = arith.constant 0 : i32
    %14 = arith.cmpi slt, %7, %c0_i32_6 : i32
    %15 = vector.broadcast %14 : i1 to vector<1x256xi1>
    %16 = vector.broadcast %15 : vector<1x256xi1> to vector<1x256xi1>
    %17 = arith.xori %13, %16 : vector<1x256xi1>
    %18 = arith.andi %17, %11 : vector<1x256xi1>
    %19 = vector.broadcast %7 : i32 to vector<1x256xi32>
    %20 = arith.addi %9, %19 : vector<1x256xi32>
    %21 = arith.select %18, %20, %9 : vector<1x256xi1>, vector<1x256xi32>
    %c0_7 = arith.constant 0 : index
    %c111_8 = arith.constant 111 : index
    %22 = vector.load %arg3[%c0_7, %c111_8] : memref<8x512xf32, #tpu.memory_space<vmem>>, vector<8x256xf32>
    %c-1_i32 = arith.constant -1 : i32
    %23 = vector.broadcast %c-1_i32 : i32 to vector<1x256xi32>
    %24 = arith.addi %21, %23 : vector<1x256xi32>
    %c0_i32_9 = arith.constant 0 : i32
    %25 = vector.broadcast %c0_i32_9 : i32 to vector<1x256xi32>
    %26 = arith.cmpi sge, %24, %25 : vector<1x256xi32>
    %c-1_i32_10 = arith.constant -1 : i32
    %27 = vector.broadcast %c-1_i32_10 : i32 to vector<1x256xi32>
    %28 = arith.addi %21, %27 : vector<1x256xi32>
    %c16_i32_11 = arith.constant 16 : i32
    %29 = vector.broadcast %c16_i32_11 : i32 to vector<1x256xi32>
    %30 = arith.cmpi slt, %28, %29 : vector<1x256xi32>
    %31 = arith.andi %26, %30 : vector<1x256xi1>
    %cst_12 = arith.constant 0.000000e+00 : f32
    %32 = vector.shape_cast %31 : vector<1x256xi1> to vector<1x256xi1>
    %33 = vector.broadcast %32 : vector<1x256xi1> to vector<8x256xi1>
    %34 = vector.broadcast %cst_12 : f32 to vector<8x256xf32>
    %35 = arith.select %33, %22, %34 : vector<8x256xi1>, vector<8x256xf32>
    %c0_13 = arith.constant 0 : index
    %c0_14 = arith.constant 0 : index
    %36 = vector.load %arg2[%c0_13, %c0_14] : memref<8x2304xf32, #tpu.memory_space<vmem>>, vector<8x256xf32>
    tpu.vector_store %arg2[%c0_13, %c0_14], %35 {strides = array<i32>} : memref<8x2304xf32, #tpu.memory_space<vmem>>, vector<8x256xf32>,
    %c0_15 = arith.constant 0 : index
    %c112 = arith.constant 112 : index
    %37 = vector.load %arg3[%c0_15, %c112] : memref<8x512xf32, #tpu.memory_space<vmem>>, vector<8x256xf32>
    %c0_16 = arith.constant 0 : index
    %c256 = arith.constant 256 : index
    %38 = vector.load %arg2[%c0_16, %c256] : memref<8x2304xf32, #tpu.memory_space<vmem>>, vector<8x256xf32>
    tpu.vector_store %arg2[%c0_16, %c256], %37 {strides = array<i32>} : memref<8x2304xf32, #tpu.memory_space<vmem>>, vector<8x256xf32>,
    %c0_17 = arith.constant 0 : index
    %c113 = arith.constant 113 : index
    %39 = vector.load %arg3[%c0_17, %c113] : memref<8x512xf32, #tpu.memory_space<vmem>>, vector<8x256xf32>
    %c1_i32_18 = arith.constant 1 : i32
    %40 = vector.broadcast %c1_i32_18 : i32 to vector<1x256xi32>
    %41 = arith.addi %21, %40 : vector<1x256xi32>
    %c0_i32_19 = arith.constant 0 : i32
    %42 = vector.broadcast %c0_i32_19 : i32 to vector<1x256xi32>
    %43 = arith.cmpi sge, %41, %42 : vector<1x256xi32>
    %c1_i32_20 = arith.constant 1 : i32
    %44 = vector.broadcast %c1_i32_20 : i32 to vector<1x256xi32>
    %45 = arith.addi %21, %44 : vector<1x256xi32>
    %c16_i32_21 = arith.constant 16 : i32
    %46 = vector.broadcast %c16_i32_21 : i32 to vector<1x256xi32>
    %47 = arith.cmpi slt, %45, %46 : vector<1x256xi32>
    %48 = arith.andi %43, %47 : vector<1x256xi1>
    %cst_22 = arith.constant 0.000000e+00 : f32
    %49 = vector.shape_cast %48 : vector<1x256xi1> to vector<1x256xi1>
    %50 = vector.broadcast %49 : vector<1x256xi1> to vector<8x256xi1>
    %51 = vector.broadcast %cst_22 : f32 to vector<8x256xf32>
    %52 = arith.select %50, %39, %51 : vector<8x256xi1>, vector<8x256xf32>
    %c0_23 = arith.constant 0 : index
    %c512 = arith.constant 512 : index
    %53 = vector.load %arg2[%c0_23, %c512] : memref<8x2304xf32, #tpu.memory_space<vmem>>, vector<8x256xf32>
    tpu.vector_store %arg2[%c0_23, %c512], %52 {strides = array<i32>} : memref<8x2304xf32, #tpu.memory_space<vmem>>, vector<8x256xf32>,
    %c0_24 = arith.constant 0 : index
    %c127 = arith.constant 127 : index
    %54 = vector.load %arg3[%c0_24, %c127] : memref<8x512xf32, #tpu.memory_space<vmem>>, vector<8x256xf32>
    %cst_25 = arith.constant 0.000000e+00 : f32
    %55 = vector.shape_cast %31 : vector<1x256xi1> to vector<1x256xi1>
    %56 = vector.broadcast %55 : vector<1x256xi1> to vector<8x256xi1>
    %57 = vector.broadcast %cst_25 : f32 to vector<8x256xf32>
    %58 = arith.select %56, %54, %57 : vector<8x256xi1>, vector<8x256xf32>
    %c0_26 = arith.constant 0 : index
    %c768 = arith.constant 768 : index
    %59 = vector.load %arg2[%c0_26, %c768] : memref<8x2304xf32, #tpu.memory_space<vmem>>, vector<8x256xf32>
    tpu.vector_store %arg2[%c0_26, %c768], %58 {strides = array<i32>} : memref<8x2304xf32, #tpu.memory_space<vmem>>, vector<8x256xf32>,
    %c0_27 = arith.constant 0 : index
    %c128_28 = arith.constant 128 : index
    %60 = vector.load %arg3[%c0_27, %c128_28] : memref<8x512xf32, #tpu.memory_space<vmem>>, vector<8x256xf32>
    %c0_29 = arith.constant 0 : index
    %c1024 = arith.constant 1024 : index
    %61 = vector.load %arg2[%c0_29, %c1024] : memref<8x2304xf32, #tpu.memory_space<vmem>>, vector<8x256xf32>
    tpu.vector_store %arg2[%c0_29, %c1024], %60 {strides = array<i32>} : memref<8x2304xf32, #tpu.memory_space<vmem>>, vector<8x256xf32>,
    %c0_30 = arith.constant 0 : index
    %c129 = arith.constant 129 : index
    %62 = vector.load %arg3[%c0_30, %c129] : memref<8x512xf32, #tpu.memory_space<vmem>>, vector<8x256xf32>
    %cst_31 = arith.constant 0.000000e+00 : f32
    %63 = vector.shape_cast %48 : vector<1x256xi1> to vector<1x256xi1>
    %64 = vector.broadcast %63 : vector<1x256xi1> to vector<8x256xi1>
    %65 = vector.broadcast %cst_31 : f32 to vector<8x256xf32>
    %66 = arith.select %64, %62, %65 : vector<8x256xi1>, vector<8x256xf32>
    %c0_32 = arith.constant 0 : index
    %c1280 = arith.constant 1280 : index
    %67 = vector.load %arg2[%c0_32, %c1280] : memref<8x2304xf32, #tpu.memory_space<vmem>>, vector<8x256xf32>
    tpu.vector_store %arg2[%c0_32, %c1280], %66 {strides = array<i32>} : memref<8x2304xf32, #tpu.memory_space<vmem>>, vector<8x256xf32>,
    %c0_33 = arith.constant 0 : index
    %c143 = arith.constant 143 : index
    %68 = vector.load %arg3[%c0_33, %c143] : memref<8x512xf32, #tpu.memory_space<vmem>>, vector<8x256xf32>
    %cst_34 = arith.constant 0.000000e+00 : f32
    %69 = vector.shape_cast %31 : vector<1x256xi1> to vector<1x256xi1>
    %70 = vector.broadcast %69 : vector<1x256xi1> to vector<8x256xi1>
    %71 = vector.broadcast %cst_34 : f32 to vector<8x256xf32>
    %72 = arith.select %70, %68, %71 : vector<8x256xi1>, vector<8x256xf32>
    %c0_35 = arith.constant 0 : index
    %c1536 = arith.constant 1536 : index
    %73 = vector.load %arg2[%c0_35, %c1536] : memref<8x2304xf32, #tpu.memory_space<vmem>>, vector<8x256xf32>
    tpu.vector_store %arg2[%c0_35, %c1536], %72 {strides = array<i32>} : memref<8x2304xf32, #tpu.memory_space<vmem>>, vector<8x256xf32>,
    %c0_36 = arith.constant 0 : index
    %c144 = arith.constant 144 : index
    %74 = vector.load %arg3[%c0_36, %c144] : memref<8x512xf32, #tpu.memory_space<vmem>>, vector<8x256xf32>
    %c0_37 = arith.constant 0 : index
    %c1792 = arith.constant 1792 : index
    %75 = vector.load %arg2[%c0_37, %c1792] : memref<8x2304xf32, #tpu.memory_space<vmem>>, vector<8x256xf32>
    tpu.vector_store %arg2[%c0_37, %c1792], %74 {strides = array<i32>} : memref<8x2304xf32, #tpu.memory_space<vmem>>, vector<8x256xf32>,
    %c0_38 = arith.constant 0 : index
    %c145 = arith.constant 145 : index
    %76 = vector.load %arg3[%c0_38, %c145] : memref<8x512xf32, #tpu.memory_space<vmem>>, vector<8x256xf32>
    %cst_39 = arith.constant 0.000000e+00 : f32
    %77 = vector.shape_cast %48 : vector<1x256xi1> to vector<1x256xi1>
    %78 = vector.broadcast %77 : vector<1x256xi1> to vector<8x256xi1>
    %79 = vector.broadcast %cst_39 : f32 to vector<8x256xf32>
    %80 = arith.select %78, %76, %79 : vector<8x256xi1>, vector<8x256xf32>
    %c0_40 = arith.constant 0 : index
    %c2048 = arith.constant 2048 : index
    %81 = vector.load %arg2[%c0_40, %c2048] : memref<8x2304xf32, #tpu.memory_space<vmem>>, vector<8x256xf32>
    tpu.vector_store %arg2[%c0_40, %c2048], %80 {strides = array<i32>} : memref<8x2304xf32, #tpu.memory_space<vmem>>, vector<8x256xf32>,
    return
  }
  func.func @transform_0(%arg0: i32) -> (i32, i32) {
    %c0_i32 = arith.constant 0 : i32
    %c0_i32_0 = arith.constant 0 : i32
    return %arg0, %c0_i32 : i32, i32
  }
  func.func @transform_1(%arg0: i32) -> (i32, i32) {
    %c0_i32 = arith.constant 0 : i32
    %c0_i32_0 = arith.constant 0 : i32
    return %arg0, %c0_i32 : i32, i32
  }
}

</mosaic_0001>

<bundles_post_ra>
// kernel: tpu_custom_call.1
= control target key start
LH: loop header
LB: loop body
LE: loop exit
PB: predicated region body
PF: predicated region fallthrough
CT: control target
= control target key end

     0   :  { %6 = vsyncpa [#allocation4], 0  ;;  %s371_s0 = inlined_call_operand.hbm [shape: f32[8,256], index: 0, kind: input, shape index: {}]   ;;  %s372_s1 = inlined_call_operand.hbm [shape: f32[8,2304], index: 1, kind: output, shape index: {}]  }
   0x1   :  { %7 = vsyncpa [#allocation5], 0  ;;  %s13_s8 = sshll.u32 %s371_s0, 4  ;;  %s329_s9 = smov [#allocation3]   ;;  %s14_s8 = int_to_ptr.hbm [resolvable:$true] %s13_s8 }
   0x2   :  { %s15_s10 = sshll.u32 %s329_s9, 4  ;;  %s16_s10 = int_to_ptr.vmem [resolvable:$true] %s15_s10 }
   0x3   :  { %18 = dma.hbm_to_vmem [thread:$0]  %s14_s8, 256, %s16_s10, [#allocation4]  }
   0x4   :  { %325 = dma.done.wait [#allocation4], 256  }
   0x5   :  { %326 = vsyncadd [#allocation4], 4294967040  ;;  %vm23_vm0 = vcmask 1048440   ;;  %v330_v0 = vmov 0.0   ;;  %v28_v1 = vld [vmem:[#allocation3 + $0x8] sm:$0xff]  ;;  %v27_v2 = vld [vmem:[#allocation3] sm:$0xff]  ;;  %v31_v8 = vlaneseq }
   0x6   :  { %24 = vst.msk [vmem:[#allocation2] sm:$0xff] %vm23_vm0, %v330_v0  ;;  %s331_s11 = smov 16   ;;  %s332_s12 = smov 17   ;;  %vm25_vm1 = vcmask 138240   ;;  %vm102_vm2 = vcmask 130048   ;;  %vm133_vm3 = vcmask 121856  }
   0x7   :  { %98 = vrot.lane.b32.xlu2 %v27_v2, %s331_s11  ;;  %166 = vst [vmem:[#allocation6 + $0x48] sm:$0xff] %v28_v1  ;;  %s333_s0 = smov 15   ;;  %s334_s13 = smov 1   ;;  %v32_v9 = vand.u32 127, %v31_v8  ;;  %vm154_vm8 = vcmask 7168   ;;  %vm179_vm9 = vcmask 1039360  }
   0x8   :  { %165 = vst [vmem:[#allocation6 + $0x40] sm:$0xff] %v27_v2  ;;  %s335_s14 = smov 127   ;;  %s336_s15 = smov 113   ;;  %vm200_vm10 = vcmask 924672   ;;  %vm240_vm11 = vcmask 908288   ;;  %vm221_vm12 = vcmask 916480  }
   0x9   :  { %26 = vst.msk [vmem:[#allocation2 + $0x18] sm:$0xff] %vm25_vm1, %v330_v0  ;;  %s337_s16 = smov 111   ;;  %s338_s17 = smov 112   ;;  %v33_v14 = vadd.s32 128, %v32_v9  ;;  %v38_v15 = vand.u32 15, %v32_v9 }
   0xa   :  { %s339_s18 = smov [#allocation6]   ;;  %s256_s22 = sshll.u32 %s372_s1, 4  ;;  %s257_s22 = int_to_ptr.hbm [resolvable:$true] %s256_s22 }
   0xb   :  { %v45_v16 = vand.u32 15, %v33_v14  ;;  %v112_v19 = vadd.s32 1, %v38_v15  ;;  %v61_v21 = vadd.s32 4294967295, %v38_v15  ;;  %s254_s19 = sshll.u32 %s339_s18, 4  ;;  %s255_s19 = int_to_ptr.vmem [resolvable:$true] %s254_s19 }
   0xd   :  { %v90_v3 = vld [vmem:[#allocation2] sm:$0xff]  ;;  %v113_v20 = vadd.s32 1, %v45_v16  ;;  %v62_v22 = vadd.s32 4294967295, %v45_v16  ;;  %vm116_vm4 = vcmp.lt.s32.totalorder %v112_v19, 16  ;;  %vm63_vm6 = vcmp.ge.s32.totalorder %v61_v21, 0 }
   0xe   :  { %96 = vrot.lane.b32.xlu1 %v90_v3, %s331_s11  ;;  %76 = vrot.lane.b32.xlu0 %v90_v3, %s332_s12 }
   0xf   :  { %100 = vrot.lane.b32.xlu2 %v28_v1, %s331_s11  ;;  %vm117_vm5 = vcmp.lt.s32.totalorder %v113_v20, 16  ;;  %vm64_vm7 = vcmp.ge.s32.totalorder %v62_v22, 0 }
  0x10   :  { %v169_v4 = vld [vmem:[#allocation2 + $0x18] sm:$0xff] }
  0x16   :  { %80 = vrot.lane.b32.xlu1 %v28_v1, %s332_s12  ;;  %127 = vrot.lane.b32.xlu0 %v90_v3, %s333_s0 }
  0x17   :  { %131 = vrot.lane.b32.xlu2 %v28_v1, %s333_s0 }
  0x1e   :  { %129 = vrot.lane.b32.xlu1 %v27_v2, %s333_s0  ;;  %78 = vrot.lane.b32.xlu0 %v27_v2, %s332_s12 }
  0x1f   :  { %152 = vrot.lane.b32.xlu2 %v28_v1, %s334_s13 }
  0x26   :  { %150 = vrot.lane.b32.xlu1 %v27_v2, %s334_s13  ;;  %148 = vrot.lane.b32.xlu0 %v90_v3, %s334_s13 }
  0x27   :  { %177 = vrot.lane.b32.xlu2 %v169_v4, %s335_s14 }
  0x2e   :  { %175 = vrot.lane.b32.xlu1 %v28_v1, %s335_s14  ;;  %173 = vrot.lane.b32.xlu0 %v27_v2, %s335_s14 }
  0x2f   :  { %198 = vrot.lane.b32.xlu2 %v169_v4, %s336_s15 }
  0x36   :  { %196 = vrot.lane.b32.xlu1 %v28_v1, %s336_s15  ;;  %194 = vrot.lane.b32.xlu0 %v27_v2, %s336_s15 }
  0x37   :  { %238 = vrot.lane.b32.xlu2 %v169_v4, %s337_s16 }
  0x3e   :  { %236 = vrot.lane.b32.xlu1 %v28_v1, %s337_s16  ;;  %234 = vrot.lane.b32.xlu0 %v27_v2, %s337_s16 }
  0x3f   :  { %219 = vrot.lane.b32.xlu2 %v169_v4, %s338_s17 }
  0x46   :  { %217 = vrot.lane.b32.xlu1 %v28_v1, %s338_s17  ;;  %215 = vrot.lane.b32.xlu0 %v27_v2, %s338_s17 }
  0x61   :  { %v99_v5 = vpop.permute.xlu2 %98 }
  0x69   :  { %v101_v6 = vpop.permute.xlu2 %100 }
  0x6a   :  { %v104_v7 = vsel %vm102_vm2, %v99_v5, %v101_v6 }
  0x6b   :  { %108 = vst [vmem:[#allocation6 + $0x18] sm:$0xff] %v104_v7 }
  0x71   :  { %v132_v13 = vpop.permute.xlu2 %131 }
  0x79   :  { %v153_v23 = vpop.permute.xlu2 %152 }
  0x80   :  { %v97_v10 = vpop.permute.xlu1 %96  ;;  %v77_v11 = vpop.permute.xlu0 %76 }
  0x81   :  { %v103_v12 = vsel %vm102_vm2, %v97_v10, %v99_v5  ;;  %v178_v34 = vpop.permute.xlu2 %177 }
  0x82   :  { %107 = vst [vmem:[#allocation6 + $0x10] sm:$0xff] %v103_v12 }
  0x88   :  { %v81_v17 = vpop.permute.xlu1 %80  ;;  %v128_v18 = vpop.permute.xlu0 %127 }
  0x89   :  { %v199_v47 = vpop.permute.xlu2 %198 }
  0x90   :  { %v130_v24 = vpop.permute.xlu1 %129  ;;  %v79_v25 = vpop.permute.xlu0 %78 }
  0x91   :  { %v134_v26 = vsel %vm133_vm3, %v128_v18, %v130_v24  ;;  %v135_v27 = vsel %vm133_vm3, %v130_v24, %v132_v13  ;;  %v82_v28 = vsel %vm25_vm1, %v77_v11, %v79_v25  ;;  %v83_v29 = vsel %vm25_vm1, %v79_v25, %v81_v17  ;;  %v239_v54 = vpop.permute.xlu2 %238 }
  0x92   :  { %v138_v30 = vsel %vm116_vm4, %v134_v26, 0.0  ;;  %v139_v31 = vsel %vm117_vm5, %v135_v27, 0.0  ;;  %v86_v32 = vsel %vm63_vm6, %v82_v28, 0.0  ;;  %v87_v33 = vsel %vm64_vm7, %v83_v29, 0.0 }
  0x93   :  { %140 = vst [vmem:[#allocation6 + $0x20] sm:$0xff] %v138_v30 }
  0x94   :  { %141 = vst [vmem:[#allocation6 + $0x28] sm:$0xff] %v139_v31 }
  0x95   :  { %88 = vst [vmem:[#allocation6] sm:$0xff] %v86_v32 }
  0x96   :  { %89 = vst [vmem:[#allocation6 + $0x8] sm:$0xff] %v87_v33 }
  0x98   :  { %v151_v35 = vpop.permute.xlu1 %150  ;;  %v149_v36 = vpop.permute.xlu0 %148 }
  0x99   :  { %v156_v37 = vsel %vm154_vm8, %v151_v35, %v153_v23  ;;  %v155_v38 = vsel %vm154_vm8, %v149_v36, %v151_v35  ;;  %v220_v61 = vpop.permute.xlu2 %219 }
  0x9a   :  { %v160_v39 = vsel %vm64_vm7, %v156_v37, 0.0  ;;  %v159_v40 = vsel %vm63_vm6, %v155_v38, 0.0 }
  0x9b   :  { %162 = vst [vmem:[#allocation6 + $0x38] sm:$0xff] %v160_v39 }
  0x9c   :  { %161 = vst [vmem:[#allocation6 + $0x30] sm:$0xff] %v159_v40 }
  0xa0   :  { %v176_v41 = vpop.permute.xlu1 %175  ;;  %v174_v42 = vpop.permute.xlu0 %173 }
  0xa1   :  { %v181_v43 = vsel %vm179_vm9, %v176_v41, %v178_v34  ;;  %v180_v44 = vsel %vm179_vm9, %v174_v42, %v176_v41 }
  0xa2   :  { %v185_v45 = vsel %vm117_vm5, %v181_v43, 0.0  ;;  %v184_v46 = vsel %vm116_vm4, %v180_v44, 0.0 }
  0xa3   :  { %187 = vst [vmem:[#allocation6 + $0x58] sm:$0xff] %v185_v45 }
  0xa4   :  { %186 = vst [vmem:[#allocation6 + $0x50] sm:$0xff] %v184_v46 }
  0xa8   :  { %v197_v48 = vpop.permute.xlu1 %196  ;;  %v195_v49 = vpop.permute.xlu0 %194 }
  0xa9   :  { %v202_v50 = vsel %vm200_vm10, %v197_v48, %v199_v47  ;;  %v201_v51 = vsel %vm200_vm10, %v195_v49, %v197_v48 }
  0xaa   :  { %v206_v52 = vsel %vm64_vm7, %v202_v50, 0.0  ;;  %v205_v53 = vsel %vm63_vm6, %v201_v51, 0.0 }
  0xab   :  { %208 = vst [vmem:[#allocation6 + $0x68] sm:$0xff] %v206_v52 }
  0xac   :  { %207 = vst [vmem:[#allocation6 + $0x60] sm:$0xff] %v205_v53 }
  0xb0   :  { %v237_v55 = vpop.permute.xlu1 %236  ;;  %v235_v56 = vpop.permute.xlu0 %234 }
  0xb1   :  { %v242_v57 = vsel %vm240_vm11, %v237_v55, %v239_v54  ;;  %v241_v58 = vsel %vm240_vm11, %v235_v56, %v237_v55 }
  0xb2   :  { %v246_v59 = vsel %vm117_vm5, %v242_v57, 0.0  ;;  %v245_v60 = vsel %vm116_vm4, %v241_v58, 0.0 }
  0xb3   :  { %248 = vst [vmem:[#allocation6 + $0x88] sm:$0xff] %v246_v59 }
  0xb4   :  { %247 = vst [vmem:[#allocation6 + $0x80] sm:$0xff] %v245_v60 }
  0xb8   :  { %v218_v62 = vpop.permute.xlu1 %217  ;;  %v216_v63 = vpop.permute.xlu0 %215 }
  0xb9   :  { %v223_v0 = vsel %vm221_vm12, %v218_v62, %v220_v61  ;;  %v222_v1 = vsel %vm221_vm12, %v216_v63, %v218_v62 }
  0xba   :  { %227 = vst [vmem:[#allocation6 + $0x78] sm:$0xff] %v223_v0 }
  0xbb   :  { %226 = vst [vmem:[#allocation6 + $0x70] sm:$0xff] %v222_v1 }
  0xbc   :  { %259 = dma.vmem_to_hbm [thread:$0]  %s255_s19, 2304, %s257_s22, [#allocation5]  }
  0xbd   :  { %327 = dma.done.wait [#allocation5], 2304  }
  0xbe   :  { %328 = vsyncadd [#allocation5], 4294964992 }
  0xbf   :  { %264 = vsyncpa [#allocation4], 1 }
  0xc0   :  { %265 = vsyncpa [#allocation5], 1 }

</bundles_post_ra>
